<compile_context>
chip_gen: v7x
topology: tpu7x:2x2x1
jax: 0.10.0
libtpu: 0.0.40
codegen_flags: <defaults>
</compile_context>

<pallas_src>
import functools
import math

import jax
import jax.numpy as jnp
import numpy as np
from jax.experimental import pallas as pl
from jax.experimental.pallas import tpu as pltpu

WINDOW_SIZE = 11
SIGMA = 1.5
ALPHA = 0.5
C1 = 0.01 ** 2
C2 = 0.03 ** 2


def _gaussian_1d(window_size: int, sigma: float) -> np.ndarray:
    center = window_size // 2
    g = np.array(
        [math.exp(-((x - center) ** 2) / float(2 * sigma ** 2)) for x in range(window_size)],
        dtype=np.float64,
    )
    return (g / g.sum()).astype(np.float32)


def _conv_matrix(n: int, window_size: int, sigma: float) -> np.ndarray:
    """Symmetric banded matrix K so that (K @ x) == SAME-padded 1D gaussian correlation."""
    g = _gaussian_1d(window_size, sigma)
    center = window_size // 2
    K = np.zeros((n, n), dtype=np.float32)
    for i in range(n):
        for a in range(n):
            k = a - i + center
            if 0 <= k < window_size:
                K[i, a] = g[k]
    return K


def _block_diag(k: np.ndarray, reps: int) -> np.ndarray:
    n = k.shape[0]
    out = np.zeros((reps * n, reps * n), dtype=np.float32)
    for r in range(reps):
        out[r * n:(r + 1) * n, r * n:(r + 1) * n] = k
    return out


def _pick_lane_planes(bc: int, w: int) -> int:
    """Planes packed along the lane dim per grid step.

    Targets: (a) P*W <= 128 and as close to 128 as possible (lane density),
    (b) at least 2 grid steps when bc allows (megacore / pipelining),
    (c) minimal zero-padding waste (prefer values with small ceil(bc/P)*P).
    """
    p_max = min(max(1, 128 // w) if w <= 128 else 1, bc)
    min_steps = 2 if bc >= 2 else 1
    best_p, best_cost = 1, None
    for p in range(1, p_max + 1):
        steps = -(-bc // p)
        if steps < min_steps:
            continue
        cost = steps * p  # total plane-slots including padding
        if best_cost is None or cost <= best_cost:
            best_p, best_cost = p, cost
    return best_p


def _combined_loss_kernel(kw_ref, kh_ref, out_ref, tgt_ref,
                          ssim_part_ref, sq_part_ref, *,
                          fuse_kh, matmul_dtype):
    o = out_ref[...]          # (H, P*W) original-range prediction planes (lane packed)
    t = tgt_ref[...]          # (H, P*W) original-range target planes
    h, pw = o.shape

    def rows_to_8(x):
        # Sublane-only partial reduction of an (R, P*W) map to an (8, P*W) tile
        # (no cross-lane XLU reduce in-kernel; finished in JAX).
        r = x.shape[0]
        if r % 8 == 0:
            return jnp.sum(x.reshape(r // 8, 8, pw), axis=0)
        s = jnp.sum(x, axis=0, keepdims=True)
        return jnp.concatenate([s, jnp.zeros((7, pw), x.dtype)], axis=0)

    # MSE accumulates on the ORIGINAL (un-rescaled) values, like nn.MSELoss.
    diff = o - t
    sq_part_ref[...] = rows_to_8(diff * diff).reshape(1, 8, pw)

    # SSIM operates on (x + 1) / 2 rescaled images (inputs assumed in [-1, 1],
    # data_range = 1 for the C1/C2 constants — same as the PyTorch module).
    p = (o + 1.0) * 0.5
    g = (t + 1.0) * 0.5

    # Five blur operands stacked along rows -> (5H, P*W); stays lane-dense.
    stacked = jnp.concatenate([p, g, p * p, g * g, p * g], axis=0)

    # Pass 1: blur along W.  Right-multiply by blockdiag_P(Kw): one lane-dense
    # MXU matmul with contraction/output width P*W (128 when fully packed).
    t1 = jnp.dot(stacked.astype(matmul_dtype), kw_ref[...].astype(matmul_dtype),
                 preferred_element_type=jnp.float32)                     # (5H, PW)

    # Pass 2: blur along H.  With lane packing this is a LEFT multiply — no
    # per-slab transpose / relayout between the two passes.
    if fuse_kh:
        r = jnp.dot(kh_ref[...].astype(matmul_dtype), t1.astype(matmul_dtype),
                    preferred_element_type=jnp.float32)                  # (5H, PW)
        mu1, mu2, e_pp, e_gg, e_pg = [r[cc * h:(cc + 1) * h, :] for cc in range(5)]
    else:
        kh = kh_ref[...].astype(matmul_dtype)
        mu1, mu2, e_pp, e_gg, e_pg = [
            jnp.dot(kh, t1[cc * h:(cc + 1) * h, :].astype(matmul_dtype),
                    preferred_element_type=jnp.float32)
            for cc in range(5)
        ]

    mu1_sq = mu1 * mu1
    mu2_sq = mu2 * mu2
    mu1_mu2 = mu1 * mu2
    sigma1_sq = e_pp - mu1_sq          # E[x^2] - mu^2 kept in f32 (cancellation-prone)
    sigma2_sq = e_gg - mu2_sq
    sigma12 = e_pg - mu1_mu2

    num = (2.0 * mu1_mu2 + C1) * (2.0 * sigma12 + C2)
    den = (mu1_sq + mu2_sq + C1) * (sigma1_sq + sigma2_sq + C2)
    # EUP approximate reciprocal + one Newton step (~f32 accuracy) instead of a
    # multi-op VPU divide.
    inv = pl.reciprocal(den, approx=True)
    inv = inv * (2.0 - den * inv)
    ssim_map = num * inv

    ssim_part_ref[...] = rows_to_8(ssim_map).reshape(1, 8, pw)


def combined_loss(output: jax.Array, target: jax.Array, alpha: float = ALPHA,
                  *, use_bf16_matmul: bool = False) -> jax.Array:
    """output, target: NCHW float arrays (values ~[-1, 1]). Returns the scalar loss."""
    assert output.shape == target.shape and output.ndim == 4
    b, c, h, w = output.shape
    bc = b * c

    planes = _pick_lane_planes(bc, w)
    n_steps = -(-bc // planes)
    bc_pad = n_steps * planes
    pw = planes * w

    # Row blocks of height H must tile by 8 sublanes when the grid splits rows.
    assert h % 8 == 0 or n_steps == 1, "H must be a multiple of 8 for lane-packed tiling"

    def repack(x):
        x = x.reshape(bc, h, w).astype(jnp.float32)
        if bc_pad > bc:
            x = jnp.concatenate([x, jnp.zeros((bc_pad - bc, h, w), jnp.float32)], axis=0)
        # (n_steps, P, H, W) -> (n_steps, H, P, W) -> (n_steps*H, P*W):
        # P planes side by side along lanes, so every in-kernel op is lane-dense.
        return (x.reshape(n_steps, planes, h, w)
                 .transpose(0, 2, 1, 3)
                 .reshape(n_steps * h, pw))

    out2d = repack(output)
    tgt2d = repack(target)

    kw = _conv_matrix(w, WINDOW_SIZE, SIGMA)
    kh = _conv_matrix(h, WINDOW_SIZE, SIGMA)
    kw_bd = jnp.asarray(_block_diag(kw, planes))          # (P*W, P*W) block-diagonal

    # Fuse pass 2's five stacked channels into one blockdiag_5(Kh) matmul while
    # the matrix is small; fall back to 5 separate (H,H) dots for large images.
    fuse_kh = (5 * h) <= 512
    kh_mat = jnp.asarray(_block_diag(kh, 5) if fuse_kh else kh)
    kh_rows = kh_mat.shape[0]

    matmul_dtype = jnp.bfloat16 if use_bf16_matmul else jnp.float32

    # Per-generation VMEM budget (v7x: 64 MiB, v5e/v6e: 128 MiB physical).
    try:
        vmem_cap = pltpu.get_tpu_info().vmem_capacity_bytes
    except Exception:  # conservative fallback
        vmem_cap = 64 * 1024 * 1024
    vmem_limit = min(96 * 1024 * 1024, int(vmem_cap * 3 // 4))

    kernel = functools.partial(_combined_loss_kernel, fuse_kh=fuse_kh,
                               matmul_dtype=matmul_dtype)

    ssim_part, sq_part = pl.pallas_call(
        kernel,
        out_shape=(
            jax.ShapeDtypeStruct((n_steps, 8, pw), jnp.float32),
            jax.ShapeDtypeStruct((n_steps, 8, pw), jnp.float32),
        ),
        grid_spec=pltpu.PrefetchScalarGridSpec(
            num_scalar_prefetch=0,
            grid=(n_steps,),
            in_specs=[
                # Constant index_map -> DMA'd once; double-buffering waste is
                # negligible at these matrix sizes (see module TODO for >=256px).
                pl.BlockSpec((pw, pw), lambda i: (0, 0)),            # blockdiag_P(Kw)
                pl.BlockSpec((kh_rows, kh_rows), lambda i: (0, 0)),  # (blockdiag_5 of) Kh
                pl.BlockSpec((h, pw), lambda i: (i, 0)),             # prediction planes
                pl.BlockSpec((h, pw), lambda i: (i, 0)),             # target planes
            ],
            out_specs=(
                pl.BlockSpec((1, 8, pw), lambda i: (i, 0, 0)),
                pl.BlockSpec((1, 8, pw), lambda i: (i, 0, 0)),
            ),
        ),
        compiler_params=pltpu.CompilerParams(
            dimension_semantics=("parallel",),
            vmem_limit_bytes=vmem_limit,
        ),
    )(kw_bd, kh_mat, out2d, tgt2d)

    # Mask lanes belonging to zero-padded tail planes, then finish the tiny
    # cross-lane / cross-step reduction in plain JAX.
    lane_plane = np.arange(pw) // w
    step_idx = np.arange(n_steps)[:, None]
    valid = jnp.asarray((step_idx * planes + lane_plane[None, :]) < bc,
                        jnp.float32)[:, None, :]                      # (n_steps, 1, P*W)

    n_elem = jnp.float32(bc * h * w)
    ssim_mean = (ssim_part * valid).sum() / n_elem
    mse_mean = (sq_part * valid).sum() / n_elem
    return alpha * (1.0 - ssim_mean) + (1.0 - alpha) * mse_mean


def _reference_combined_loss(output, target, alpha=ALPHA):
    """Plain-JAX reference (same math, no Pallas) for sanity checking."""
    b, c, h, w = output.shape
    kh = jnp.asarray(_conv_matrix(h, WINDOW_SIZE, SIGMA))
    kw = jnp.asarray(_conv_matrix(w, WINDOW_SIZE, SIGMA))

    def blur(x):  # x: (B, C, H, W)
        return jnp.einsum("ih,bchw,jw->bcij", kh, x, kw)

    p = (output + 1.0) * 0.5
    g = (target + 1.0) * 0.5
    mu1, mu2 = blur(p), blur(g)
    mu1_sq, mu2_sq, mu1_mu2 = mu1 * mu1, mu2 * mu2, mu1 * mu2
    s1 = blur(p * p) - mu1_sq
    s2 = blur(g * g) - mu2_sq
    s12 = blur(p * g) - mu1_mu2
    ssim_map = ((2 * mu1_mu2 + C1) * (2 * s12 + C2)) / ((mu1_sq + mu2_sq + C1) * (s1 + s2 + C2))
    ssim_loss = 1.0 - jnp.mean(ssim_map)
    mse = jnp.mean((output - target) ** 2)
    return alpha * ssim_loss + (1.0 - alpha) * mse


if __name__ == "__main__":
    key = jax.random.PRNGKey(0)
    k1, k2 = jax.random.split(key)
    B, C, H, W = 2, 4, 16, 16
    # Values roughly in [-1, 1], like tanh-normalized images.
    output = jnp.tanh(jax.random.normal(k1, (B, C, H, W), dtype=jnp.float32))
    target = jnp.tanh(jax.random.normal(k2, (B, C, H, W), dtype=jnp.float32))

    loss = jax.block_until_ready(combined_loss(output, target))
    ref = jax.block_until_ready(_reference_combined_loss(output, target))

    assert jnp.isfinite(loss), "kernel produced non-finite loss"
    assert abs(float(loss) - float(ref)) < 1e-4, f"mismatch: {float(loss)} vs {float(ref)}"

    print("KERNEL_OK")
</pallas_src>

<mosaic_0001>
module attributes {stable_mosaic.version = 11 : i64} {
  func.func @_combined_loss_kernel(%arg0: i32, %arg1: memref<64x64xf32, #tpu.memory_space<vmem>>, %arg2: memref<80x80xf32, #tpu.memory_space<vmem>>, %arg3: memref<16x64xf32, #tpu.memory_space<vmem>>, %arg4: memref<16x64xf32, #tpu.memory_space<vmem>>, %arg5: memref<1x8x64xf32, #tpu.memory_space<vmem>>, %arg6: memref<1x8x64xf32, #tpu.memory_space<vmem>>) attributes {dimension_semantics = [#tpu.dimension_semantics<parallel>], iteration_bounds = array<i64: 2>, scalar_prefetch = 0 : i64, scratch_operands = 0 : i64, tpu.core_type = #tpu.core_type<tc>, window_params = [{pipeline_mode = #tpu.pipeline_mode<synchronous>, transform_indices = @transform_0, window_bounds = array<i64: 64, 64>}, {pipeline_mode = #tpu.pipeline_mode<synchronous>, transform_indices = @transform_1, window_bounds = array<i64: 80, 80>}, {transform_indices = @transform_2, window_bounds = array<i64: 16, 64>}, {transform_indices = @transform_3, window_bounds = array<i64: 16, 64>}, {transform_indices = @transform_4, window_bounds = array<i64: 1, 8, 64>}, {transform_indices = @transform_5, window_bounds = array<i64: 1, 8, 64>}]} {
    %c0 = arith.constant 0 : index
    %c0_0 = arith.constant 0 : index
    %0 = vector.load %arg3[%c0, %c0_0] : memref<16x64xf32, #tpu.memory_space<vmem>>, vector<16x64xf32>
    %c0_1 = arith.constant 0 : index
    %c0_2 = arith.constant 0 : index
    %1 = vector.load %arg4[%c0_1, %c0_2] : memref<16x64xf32, #tpu.memory_space<vmem>>, vector<16x64xf32>
    %2 = arith.subf %0, %1 : vector<16x64xf32>
    %3 = arith.mulf %2, %2 : vector<16x64xf32>
    %4 = vector.shape_cast %3 : vector<16x64xf32> to vector<2x8x64xf32>
    %cst = arith.constant dense<0.000000e+00> : vector<8x64xf32>
    %5 = vector.multi_reduction <add>, %4, %cst [0] : vector<2x8x64xf32> to vector<8x64xf32>
    %6 = vector.shape_cast %5 : vector<8x64xf32> to vector<1x8x64xf32>
    %c0_3 = arith.constant 0 : index
    %c0_4 = arith.constant 0 : index
    %c0_5 = arith.constant 0 : index
    %7 = vector.load %arg6[%c0_3, %c0_4, %c0_5] : memref<1x8x64xf32, #tpu.memory_space<vmem>>, vector<1x8x64xf32>
    tpu.vector_store %arg6[%c0_3, %c0_4, %c0_5], %6 {strides = array<i32>} : memref<1x8x64xf32, #tpu.memory_space<vmem>>, vector<1x8x64xf32>,
    %cst_6 = arith.constant 1.000000e+00 : f32
    %8 = vector.broadcast %cst_6 : f32 to vector<16x64xf32>
    %9 = arith.addf %0, %8 : vector<16x64xf32>
    %cst_7 = arith.constant 5.000000e-01 : f32
    %10 = vector.broadcast %cst_7 : f32 to vector<16x64xf32>
    %11 = arith.mulf %9, %10 : vector<16x64xf32>
    %cst_8 = arith.constant 1.000000e+00 : f32
    %12 = vector.broadcast %cst_8 : f32 to vector<16x64xf32>
    %13 = arith.addf %1, %12 : vector<16x64xf32>
    %cst_9 = arith.constant 5.000000e-01 : f32
    %14 = vector.broadcast %cst_9 : f32 to vector<16x64xf32>
    %15 = arith.mulf %13, %14 : vector<16x64xf32>
    %16 = arith.mulf %11, %11 : vector<16x64xf32>
    %17 = arith.mulf %15, %15 : vector<16x64xf32>
    %18 = arith.mulf %11, %15 : vector<16x64xf32>
    %19 = tpu.concatenate %11, %15, %16, %17, %18 in 0 : vector<16x64xf32>, vector<16x64xf32>, vector<16x64xf32>, vector<16x64xf32>, vector<16x64xf32> -> vector<80x64xf32>
    %c0_10 = arith.constant 0 : index
    %c0_11 = arith.constant 0 : index
    %20 = vector.load %arg1[%c0_10, %c0_11] : memref<64x64xf32, #tpu.memory_space<vmem>>, vector<64x64xf32>
    %cst_12 = arith.constant dense<0.000000e+00> : vector<80x64xf32>
    %21 = tpu.matmul %19, %20, %cst_12 {dimension_numbers = #tpu.dot_dimension_numbers<[1], [0], [0], [1], [0, 0, 1, 1], [], []>} : vector<80x64xf32>, vector<64x64xf32>, vector<80x64xf32> -> vector<80x64xf32>
    %c0_13 = arith.constant 0 : index
    %c0_14 = arith.constant 0 : index
    %22 = vector.load %arg2[%c0_13, %c0_14] : memref<80x80xf32, #tpu.memory_space<vmem>>, vector<80x80xf32>
    %cst_15 = arith.constant dense<0.000000e+00> : vector<80x64xf32>
    %23 = tpu.matmul %22, %21, %cst_15 {dimension_numbers = #tpu.dot_dimension_numbers<[1], [0], [0], [1], [0, 0, 1, 1], [], []>} : vector<80x80xf32>, vector<80x64xf32>, vector<80x64xf32> -> vector<80x64xf32>
    %24 = vector.extract_strided_slice %23 {offsets = [0, 0], sizes = [16, 64], strides = [1, 1]} : vector<80x64xf32> to vector<16x64xf32>
    %25 = vector.extract_strided_slice %23 {offsets = [16, 0], sizes = [16, 64], strides = [1, 1]} : vector<80x64xf32> to vector<16x64xf32>
    %26 = vector.extract_strided_slice %23 {offsets = [32, 0], sizes = [16, 64], strides = [1, 1]} : vector<80x64xf32> to vector<16x64xf32>
    %27 = vector.extract_strided_slice %23 {offsets = [48, 0], sizes = [16, 64], strides = [1, 1]} : vector<80x64xf32> to vector<16x64xf32>
    %28 = vector.extract_strided_slice %23 {offsets = [64, 0], sizes = [16, 64], strides = [1, 1]} : vector<80x64xf32> to vector<16x64xf32>
    %29 = arith.mulf %24, %24 : vector<16x64xf32>
    %30 = arith.mulf %25, %25 : vector<16x64xf32>
    %31 = arith.mulf %24, %25 : vector<16x64xf32>
    %32 = arith.subf %26, %29 : vector<16x64xf32>
    %33 = arith.subf %27, %30 : vector<16x64xf32>
    %34 = arith.subf %28, %31 : vector<16x64xf32>
    %cst_16 = arith.constant 2.000000e+00 : f32
    %35 = vector.broadcast %cst_16 : f32 to vector<16x64xf32>
    %36 = arith.mulf %35, %31 : vector<16x64xf32>
    %cst_17 = arith.constant 9.99999974E-5 : f32
    %37 = vector.broadcast %cst_17 : f32 to vector<16x64xf32>
    %38 = arith.addf %36, %37 : vector<16x64xf32>
    %cst_18 = arith.constant 2.000000e+00 : f32
    %39 = vector.broadcast %cst_18 : f32 to vector<16x64xf32>
    %40 = arith.mulf %39, %34 : vector<16x64xf32>
    %cst_19 = arith.constant 8.99999984E-4 : f32
    %41 = vector.broadcast %cst_19 : f32 to vector<16x64xf32>
    %42 = arith.addf %40, %41 : vector<16x64xf32>
    %43 = arith.mulf %38, %42 : vector<16x64xf32>
    %44 = arith.addf %29, %30 : vector<16x64xf32>
    %cst_20 = arith.constant 9.99999974E-5 : f32
    %45 = vector.broadcast %cst_20 : f32 to vector<16x64xf32>
    %46 = arith.addf %44, %45 : vector<16x64xf32>
    %47 = arith.addf %32, %33 : vector<16x64xf32>
    %cst_21 = arith.constant 8.99999984E-4 : f32
    %48 = vector.broadcast %cst_21 : f32 to vector<16x64xf32>
    %49 = arith.addf %47, %48 : vector<16x64xf32>
    %50 = arith.mulf %46, %49 : vector<16x64xf32>
    %51 = tpu.reciprocal %50 {approx = true} : vector<16x64xf32> -> vector<16x64xf32>
    %52 = arith.mulf %50, %51 : vector<16x64xf32>
    %cst_22 = arith.constant 2.000000e+00 : f32
    %53 = vector.broadcast %cst_22 : f32 to vector<16x64xf32>
    %54 = arith.subf %53, %52 : vector<16x64xf32>
    %55 = arith.mulf %51, %54 : vector<16x64xf32>
    %56 = arith.mulf %43, %55 : vector<16x64xf32>
    %57 = vector.shape_cast %56 : vector<16x64xf32> to vector<2x8x64xf32>
    %cst_23 = arith.constant dense<0.000000e+00> : vector<8x64xf32>
    %58 = vector.multi_reduction <add>, %57, %cst_23 [0] : vector<2x8x64xf32> to vector<8x64xf32>
    %59 = vector.shape_cast %58 : vector<8x64xf32> to vector<1x8x64xf32>
    %c0_24 = arith.constant 0 : index
    %c0_25 = arith.constant 0 : index
    %c0_26 = arith.constant 0 : index
    %60 = vector.load %arg5[%c0_24, %c0_25, %c0_26] : memref<1x8x64xf32, #tpu.memory_space<vmem>>, vector<1x8x64xf32>
    tpu.vector_store %arg5[%c0_24, %c0_25, %c0_26], %59 {strides = array<i32>} : memref<1x8x64xf32, #tpu.memory_space<vmem>>, vector<1x8x64xf32>,
    return
  }
  func.func @transform_0(%arg0: i32) -> (i32, i32) {
    %c0_i32 = arith.constant 0 : i32
    %c0_i32_0 = arith.constant 0 : i32
    %c0_i32_1 = arith.constant 0 : i32
    return %c0_i32, %c0_i32_0 : i32, i32
  }
  func.func @transform_1(%arg0: i32) -> (i32, i32) {
    %c0_i32 = arith.constant 0 : i32
    %c0_i32_0 = arith.constant 0 : i32
    %c0_i32_1 = arith.constant 0 : i32
    return %c0_i32, %c0_i32_0 : i32, i32
  }
  func.func @transform_2(%arg0: i32) -> (i32, i32) {
    %c0_i32 = arith.constant 0 : i32
    %c0_i32_0 = arith.constant 0 : i32
    return %arg0, %c0_i32 : i32, i32
  }
  func.func @transform_3(%arg0: i32) -> (i32, i32) {
    %c0_i32 = arith.constant 0 : i32
    %c0_i32_0 = arith.constant 0 : i32
    return %arg0, %c0_i32 : i32, i32
  }
  func.func @transform_4(%arg0: i32) -> (i32, i32, i32) {
    %c0_i32 = arith.constant 0 : i32
    %c0_i32_0 = arith.constant 0 : i32
    %c0_i32_1 = arith.constant 0 : i32
    return %arg0, %c0_i32, %c0_i32_0 : i32, i32, i32
  }
  func.func @transform_5(%arg0: i32) -> (i32, i32, i32) {
    %c0_i32 = arith.constant 0 : i32
    %c0_i32_0 = arith.constant 0 : i32
    %c0_i32_1 = arith.constant 0 : i32
    return %arg0, %c0_i32, %c0_i32_0 : i32, i32, i32
  }
}

</mosaic_0001>

<bundles_post_ra>
// kernel: tpu_custom_call.1
= control target key start
LH: loop header
LB: loop body
LE: loop exit
PB: predicated region body
PF: predicated region fallthrough
CT: control target
= control target key end

     0   :  { %s1747_s0 = inlined_call_operand.hbm [shape: f32[64,64], index: 0, kind: input, shape index: {}]   ;;  %s1748_s1 = inlined_call_operand.hbm [shape: f32[80,80], index: 1, kind: input, shape index: {}]   ;;  %s1749_s2 = inlined_call_operand.hbm [shape: f32[32,64], index: 2, kind: input, shape index: {}]   ;;  %s1750_s3 = inlined_call_operand.hbm [shape: f32[32,64], index: 3, kind: input, shape index: {}]   ;;  %s1751_s4 = inlined_call_operand.hbm [shape: f32[2,8,64], index: 4, kind: output, shape index: {0}]   ;;  %s1752_s5 = inlined_call_operand.hbm [shape: f32[2,8,64], index: 5, kind: output, shape index: {1}]  }
   0x1   :  { %1767 = sst [smem:[#allocation20_spill]] %s1747_s0 }
   0x2   :  { %1768 = sst [smem:[#allocation21_spill]] %s1749_s2 }
   0x3   :  { %11 = vsyncpa [#allocation3], 0 }
   0x4   :  { %12 = vsyncpa [#allocation6], 0 }
   0x5   :  { %13 = vsyncpa [#allocation4], 0 }
   0x6   :  { %15 = vsyncpa [#allocation4 + $0x1], 0 }
   0x7   :  { %16 = vsyncpa [#allocation11], 0 }
   0x8   :  { %18 = vsyncpa [#allocation11 + $0x1], 0  ;;  %s1406_s18 = smov 0   ;;  %s1408_s19 = smov 0  }
   0x9   :  { %s1410_s20 = smov 0   ;;  %s1412_s21 = smov 0  }
   0xa LB: > { %1769 = sst [smem:[#allocation17_spill]] %s1362_s20  ;;  %s1427_s22 = sadd.s32 4294967295, %s1366_s21   ;;  %s1366_s21 = sphi %s1412_s21, %s1799_s21   ;;  %s1362_s20 = sphi %s1410_s20, %s1801_s20   ;;  %s1358_s19 = sphi %s1408_s19, %s1803_s19   ;;  %s1354_s18 = sphi %s1406_s18, %s1802_s18  }
   0xb   : > { %s875_s23 = sadd.s32 4294967294, %s1366_s21   ;;  %s1431_s24 = sadd.s32 1, %s1366_s21  }
   0xc   : > { %1770 = sst [smem:[#allocation18_spill]] %s1431_s24  ;;  %s73_s25 = sadd.s32 1, %s1362_s20 }
   0xd   : > { %s70_s26 = ssub.s32 %s1366_s21, %s1431_s24  ;;  %p80_p0 = scmp.ne.s32.totalorder %s1362_s20, %s1358_s19 }
   0xe   : > { %p71_p1 = scmp.eq.s32.totalorder %s70_s26, 0  ;;  %p81_p2 = scmp.eq.s32.totalorder %s1366_s21, 0 }
   0xf   : > { %p86_p3 = scmp.ne.s32.totalorder %s1358_s19, %s1354_s18  ;;  %p1753_p4 = scmp.eq.s32.totalorder %s1427_s22, 0 }
  0x10   : > { %s1443_s27 = scalar_select %p71_p1, %s1362_s20, %s73_s25  }
  0x11   : > { %p1445_p5 = por %p81_p2, %p80_p0  ;;  %p1451_p6 = por %p1753_p4, %p86_p3 }
  0x12   : > { %1771 = sst [smem:[#allocation19_spill]] %s1443_s27  ;;  %p136_p7 = scmp.eq.s32.totalorder %s1427_s22, 1 }
  0x13   : > { %s1772_s28 = scalar_select %p1445_p5, 1, 0 }
  0x14   : > { %s1773_s29 = scalar_select %p1451_p6, 1, 0 }
  0x15   : > { %p142_p8 = scmp.eq.s32.totalorder %s875_s23, 1  ;;  %p876_p9 = scmp.ge.s32.totalorder %s1366_s21, 1 }
  0x16   : > { %p175_p10 = scmp.lt.s32.totalorder %s1366_s21, 3  ;;  %p1458_p11 = por %p136_p7, %p80_p0 }
  0x17   : > { %p1462_p12 = por %p142_p8, %p86_p3  ;;  %s1368_s8 = smov [#allocation2]  }
  0x18   : > { %s1774_s30 = scalar_select %p1458_p11, 1, 0 }
  0x19   : > { %s1775_s6 = scalar_select %p1462_p12, 1, 0 }
  0x1a   : > { %p1466_p13 = pnand %p876_p9, %p175_p10  ;;  %s187_s9 = sshll.u32 %s1368_s8, 4  ;;  %s188_s9 = int_to_ptr.vmem [resolvable:$true] %s187_s9 }
  0x1b   : > { %s214_s11 = sand.u32 1, %s1366_s21   ;;  %s1778_s0 = sld [smem:[#allocation20_spill]] }
  0x1c   : > { %s1776_s7 = scalar_select %p1466_p13, 1, 0 }
  0x1d   : > { %p1077_p1 = pneg %p1466_p13 }
  0x1f   : > { %p1474_p2 = pnand %p1077_p1, %p1753_p4 }
  0x21   : > { %s1144_s14 = scalar_lea.hbm %s1778_s0, 1024  ;;  %p1760_p8 = pneg %p1474_p2 }
  0x22   : > { %p1145_p7 = scmp.ne.s32.totalorder %s1778_s0, %s1144_s14  ;;  %p1151_p1 = scmp.lt.u32.totalorder %s1144_s14, %s1778_s0 }
  0x24   : > { %p1147_p9 = pnand %p1760_p8, %p1145_p7 }
  0x26   : > { %p1148_p10 = pneg %p1147_p9 }
  0x28   : > { %p1153_p0 = pnand %p1151_p1, %p1148_p10 }
  0x2a   : > { %1156 = shalt.err (!%p1153_p0)
}
  0x2b   : > { %s1157_s25 = scalar_lea.vmem %s188_s9, 1024  ;;  %p1165_p11 = scmp.lt.s32.totalorder %s188_s9, %s188_s9 }
  0x2c   : > { %p1158_p4 = scmp.ne.s32.totalorder %s188_s9, %s1157_s25  ;;  %p1166_p6 = scmp.lt.s32.totalorder %s1157_s25, %s1157_s25 }
  0x2e   : > { %p1160_p3 = pnand %p1158_p4, %p1760_p8  ;;  %p1167_p13 = por %p1166_p6, %p1165_p11 }
  0x30   : > { %p1161_p12 = pneg %p1160_p3 }
  0x32   : > { %p1168_p5 = pnand %p1167_p13, %p1161_p12 }
  0x34   : > { %1171 = shalt.err (!%p1168_p5)
}
  0x35   : > { %s1758_s26 = smov 128   ;;  %s1370_s8 = smov 8  }
  0x36   : > { %1080 = dma.hbm_to_vmem [thread:$0]  (!%p1474_p2), %s1778_s0, 1024, %s188_s9, [#allocation3], %s1758_s26, %s1758_s26, %s1370_s8  }
  0x37   : > { %p1779_p4 = scmp.ne.s32.totalorder %s1772_s28, 0  ;;  %p1780_p6 = scmp.lt.s32.totalorder %s1366_s21, 2 }
  0x38   : > { %s216_s15 = sand.u32 1, %s1362_s20   ;;  %s1757_s17 = sshll.u32 %s1366_s21, 8 }
  0x39   : > { %p1510_p11 = pnand %p1780_p6, %p1779_p4  ;;  %s1515_s16 = sshll.u32 %s216_s15, 4 }
  0x3a   : > { %s1782_s2 = sld [smem:[#allocation21_spill]]  ;;  %s218_s28 = scalar_lea.vmem [#allocation7], %s1515_s16 }
  0x3b   : > { %s1781_s14 = scalar_select %p1510_p11, 1, 0 }
  0x3c   : > { %s225_s9 = sshll.u32 %s218_s28, 4  ;;  %s1528_s12 = scalar_lea.sflag [#allocation3], %s214_s11  ;;  %s1526_s9 = int_to_ptr.vmem [resolvable:$true] %s225_s9 }
  0x3d   : > { %p1764_p12 = pneg %p1510_p11 }
  0x40   : > { %s1523_s27 = scalar_lea.hbm %s1782_s2, %s1757_s17  ;;  %s1177_s25 = scalar_lea.hbm %s1782_s2, 512 }
  0x41   : > { %s1172_s13 = scalar_lea.hbm %s1523_s27, 256  ;;  %p1178_p3 = scmp.lt.u32.totalorder %s1523_s27, %s1782_s2 }
  0x42   : > { %p1173_p5 = scmp.ne.s32.totalorder %s1523_s27, %s1172_s13  ;;  %p1179_p7 = scmp.lt.u32.totalorder %s1177_s25, %s1172_s13 }
  0x43   : > { %p1181_p10 = scmp.lt.u32.totalorder %s1172_s13, %s1523_s27 }
  0x44   : > { %p1175_p13 = pnand %p1764_p12, %p1173_p5  ;;  %p1180_p9 = por %p1179_p7, %p1178_p3 }
  0x46   : > { %p1176_p0 = pneg %p1175_p13  ;;  %p1182_p1 = por %p1181_p10, %p1180_p9 }
  0x48   : > { %p1183_p4 = pnand %p1182_p1, %p1176_p0 }
  0x4a   : > { %1186 = shalt.err (!%p1183_p4)
}
  0x4b   : > { %s1187_s11 = scalar_lea.vmem %s1526_s9, 256  ;;  %s1371_s28 = smov [#allocation7]  }
  0x4c   : > { %p1188_p6 = scmp.ne.s32.totalorder %s1526_s9, %s1187_s11  ;;  %s1192_s15 = sshll.u32 %s1371_s28, 4  ;;  %s1193_s15 = int_to_ptr.vmem [resolvable:$false] %s1192_s15 }
  0x4d   : > { %s1194_s26 = scalar_lea.vmem %s1193_s15, 512  ;;  %p1195_p8 = scmp.lt.s32.totalorder %s1526_s9, %s1193_s15 }
  0x4e   : > { %p1190_p5 = pnand %p1188_p6, %p1764_p12  ;;  %p1196_p3 = scmp.lt.s32.totalorder %s1194_s26, %s1187_s11 }
  0x50   : > { %p1191_p13 = pneg %p1190_p5  ;;  %p1197_p7 = por %p1196_p3, %p1195_p8 }
  0x52   : > { %p1198_p9 = pnand %p1197_p7, %p1191_p13 }
  0x54   : > { %1201 = shalt.err (!%p1198_p9)
}
  0x55   : > { %s1783_s17 = smov 128   ;;  %s1372_s13 = smov [#allocation5]  }
  0x56   : > { %1087 = dma.hbm_to_vmem [thread:$0]  (!%p1510_p11), %s1523_s27, 256, %s1526_s9, %s1528_s12, %s1783_s17, %s1783_s17, %s1370_s8  }
  0x57   : > { %s200_s23 = sshll.u32 %s1372_s13, 4  ;;  %s1784_s25 = sshll.u32 %s1366_s21, 8  ;;  %s201_s23 = int_to_ptr.vmem [resolvable:$true] %s200_s23 }
  0x58   : > { %s1564_s15 = scalar_lea.hbm %s1750_s3, %s1784_s25  ;;  %s1202_s2 = scalar_lea.hbm %s1748_s1, 1280 }
  0x59   : > { %p1203_p8 = scmp.ne.s32.totalorder %s1748_s1, %s1202_s2  ;;  %p1785_p0 = pneg %p1474_p2 }
  0x5a   : > { %p1209_p4 = scmp.lt.u32.totalorder %s1202_s2, %s1748_s1 }
  0x5b   : > { %p1205_p10 = pnand %p1203_p8, %p1785_p0 }
  0x5d   : > { %p1206_p1 = pneg %p1205_p10 }
  0x5f   : > { %p1211_p6 = pnand %p1209_p4, %p1206_p1 }
  0x61   : > { %1214 = shalt.err (!%p1211_p6)
}
  0x62   : > { %s1215_s13 = scalar_lea.vmem %s201_s23, 1280  ;;  %p1786_p13 = pmov %p1785_p0 }
  0x63   : > { %p1216_p5 = scmp.ne.s32.totalorder %s201_s23, %s1215_s13  ;;  %p1223_p9 = scmp.lt.s32.totalorder %s201_s23, %s201_s23 }
  0x64   : > { %p1224_p12 = scmp.lt.s32.totalorder %s1215_s13, %s1215_s13 }
  0x65   : > { %p1218_p3 = pnand %p1216_p5, %p1786_p13 }
  0x66   : > { %p1225_p11 = por %p1224_p12, %p1223_p9 }
  0x67   : > { %p1219_p7 = pneg %p1218_p3 }
  0x69   : > { %p1226_p0 = pnand %p1225_p11, %p1219_p7 }
  0x6b   : > { %1229 = shalt.err (!%p1226_p0)
}
  0x6c   : > { %1083 = dma.hbm_to_vmem [thread:$0]  (!%p1474_p2), %s1748_s1, 1280, %s201_s23, [#allocation6], %s1783_s17, %s1783_s17, %s1370_s8  }
  0x6d   : > { %s239_s20 = scalar_lea.vmem [#allocation8], %s1515_s16  ;;  %s1230_s25 = scalar_lea.hbm %s1564_s15, 256 }
  0x6e   : > { %s246_s24 = sshll.u32 %s239_s20, 4  ;;  %p1231_p11 = scmp.ne.s32.totalorder %s1564_s15, %s1230_s25  ;;  %s1590_s24 = int_to_ptr.vmem [resolvable:$true] %s246_s24 }
  0x6f   : > { %p1787_p12 = scmp.ne.s32.totalorder %s1781_s14, 0  ;;  %s1235_s11 = scalar_lea.hbm %s1750_s3, 512 }
  0x70   : > { %p1236_p4 = scmp.lt.u32.totalorder %s1564_s15, %s1750_s3  ;;  %p1237_p6 = scmp.lt.u32.totalorder %s1235_s11, %s1230_s25 }
  0x71   : > { %p1788_p8 = pneg %p1787_p12  ;;  %p1239_p5 = scmp.lt.u32.totalorder %s1230_s25, %s1564_s15 }
  0x72   : > { %p1238_p2 = por %p1237_p6, %p1236_p4 }
  0x73   : > { %p1233_p10 = pnand %p1231_p11, %p1788_p8 }
  0x74   : > { %p1240_p13 = por %p1239_p5, %p1238_p2 }
  0x75   : > { %p1234_p1 = pneg %p1233_p10 }
  0x77   : > { %p1241_p3 = pnand %p1240_p13, %p1234_p1 }
  0x79   : > { %1244 = shalt.err (!%p1241_p3)
}
  0x7a   : > { %s1245_s16 = scalar_lea.vmem %s1590_s24, 256  ;;  %p1789_p9 = pmov %p1788_p8 }
  0x7b   : > { %p1246_p7 = scmp.ne.s32.totalorder %s1590_s24, %s1245_s16  ;;  %s1373_s23 = smov [#allocation8]  }
  0x7c   : > { %s1250_s9 = sshll.u32 %s1373_s23, 4  ;;  %s1251_s9 = int_to_ptr.vmem [resolvable:$false] %s1250_s9 }
  0x7d   : > { %p1248_p0 = pnand %p1246_p7, %p1789_p9  ;;  %s1252_s13 = scalar_lea.vmem %s1251_s9, 512 }
  0x7e   : > { %p1253_p8 = scmp.lt.s32.totalorder %s1590_s24, %s1251_s9  ;;  %p1254_p10 = scmp.lt.s32.totalorder %s1252_s13, %s1245_s16 }
  0x7f   : > { %p1249_p11 = pneg %p1248_p0 }
  0x80   : > { %p1255_p4 = por %p1254_p10, %p1253_p8 }
  0x82   : > { %p1256_p6 = pnand %p1255_p4, %p1249_p11 }
  0x84   : > { %1259 = shalt.err (!%p1256_p6)
}
  0x85   : > { %1090 = dma.hbm_to_vmem [thread:$0]  (!%p1787_p12), %s1564_s15, 256, %s1590_s24, %s1528_s12, %s1783_s17, %s1783_s17, %s1370_s8  }
  0x86   : > { %p1790_p1 = scmp.ne.s32.totalorder %s1776_s7, 0 }
  0x87   : > { %p1791_p2 = scmp.eq.s32.totalorder (!%p1790_p1), %s1427_s22, 0 }
  0x88   : > { %258 = sbr.rel (%p1790_p1) target bundleno = 675 (0x2a3), region = 36 }
  0x8f   : > { %1333 = dma.done.wait (%p1791_p2), [#allocation3], 1024   ;;  %p1792_p5 = pmov %p1791_p2 }
  0x90   : > { %p1793_p13 = pmov %p1791_p2 }
  0x91   : > { %1335 = vsyncadd (%p1792_p5), [#allocation3], 4294966272 }
  0x92   : > { %1337 = dma.done.wait (%p1793_p13), [#allocation6], 1280   ;;  %p1794_p3 = pmov %p1791_p2 }
  0x93   : > { %s268_s14 = sand.u32 1, %s1427_s22   ;;  %s1631_s8 = sand.u32 1, %s1358_s19  }
  0x94   : > { %1339 = vsyncadd (%p1794_p3), [#allocation6], 4294966016  ;;  %s889_s7 = sshll.u32 %s1631_s8, 4  ;;  %s269_s12 = scalar_lea.sflag [#allocation3], %s268_s14 }
  0x95   : > { %s272_s17 = scalar_lea.vmem [#allocation7], %s889_s7  ;;  %p1795_p12 = scmp.ne.s32.totalorder %s1773_s29, 0 }
  0x97   : > { %1341 = dma.done.wait (%p1795_p12), %s269_s12, 512  }
  0x98   : > { %1343 = vsyncadd (%p1795_p12), %s269_s12, 4294966784  ;;  %v347_v0 = vld [vmem:[#allocation2] sm:$0xff]  ;;  %v348_v1 = vld [vmem:[#allocation2 + $0x8] sm:$0xff]  ;;  %s281_s15 = scalar_lea.vmem [#allocation8], %s889_s7  ;;  %vm328_vm0 = vcmask 523264   ;;  %vm510_vm1 = vcmask 654336  }
  0x99   : > { %v349_v2 = vld [vmem:[#allocation2 + $0x10] sm:$0xff]  ;;  %v1025_v3 = vpack.c.bf16 %v348_v1, %v347_v0  ;;  %v350_v4 = vld [vmem:[#allocation2 + $0x18] sm:$0xff]  ;;  %v351_v6 = vld [vmem:[#allocation2 + $0x20] sm:$0xff]  ;;  %s891_s29 = sshll.u32 %s1631_s8, 3  ;;  %s915_s0 = sshll.u32 %s1427_s22, 7 }
  0x9a   : > { %v1029_v5 = vpack.c.bf16 %v350_v4, %v349_v2  ;;  %v352_v7 = vld [vmem:[#allocation2 + $0x28] sm:$0xff]  ;;  %v320_v8 = vld [vmem:[%s272_s17] sm:$0xff]  ;;  %v354_v18 = vld [vmem:[#allocation2 + $0x38] sm:$0xff]  ;;  %s317_s2 = scalar_lea.vmem [#allocation10], %s891_s29  ;;  %s1673_s25 = scalar_lea.hbm %s1752_s5, %s915_s0 }
  0x9b   : > { %1026 = vmatprep.subr.bf16.mxu0 %v1025_v3  ;;  %v322_v9 = vld [vmem:[%s281_s15] sm:$0xff]  ;;  %v333_v10 = vadd.f32 1.0, %v320_v8  ;;  %v321_v11 = vld [vmem:[%s272_s17 + $0x8] sm:$0xff]  ;;  %v1033_v15 = vpack.c.bf16 %v352_v7, %v351_v6  ;;  %s734_s10 = sshll.u32 %s317_s2, 4  ;;  %s708_s28 = scalar_lea.sflag [#allocation11], %s1631_s8  ;;  %s735_s10 = int_to_ptr.vmem [resolvable:$true] %s734_s10 }
  0x9c   : > { %v323_v12 = vld [vmem:[%s281_s15 + $0x8] sm:$0xff]  ;;  %1028 = vmatpush3.bf16.msra.mxu0 %v1025_v3  ;;  %v324_v13 = vsub.f32 %v320_v8, %v322_v9  ;;  %v353_v17 = vld [vmem:[#allocation2 + $0x30] sm:$0xff]  ;;  %v334_v25 = vadd.f32 1.0, %v321_v11  ;;  %v337_v26 = vadd.f32 1.0, %v322_v9  ;;  %v500_v37 = vld [vmem:[#allocation5] sm:$0xff]  ;;  %s1260_s11 = scalar_lea.vmem %s735_s10, 128 }
  0x9d   : > { %v325_v14 = vsub.f32 %v321_v11, %v323_v12  ;;  %1030 = vmatprep.subr.bf16.mxu0 %v1029_v5  ;;  %v335_v16 = vmul.f32 0.5, %v333_v10  ;;  %v1037_v23 = vpack.c.bf16 %v354_v18, %v353_v17  ;;  %v338_v28 = vadd.f32 1.0, %v323_v12  ;;  %1010 = vmatprep.mubr.msk.f32.mxu1 %vm510_vm1, %v500_v37  ;;  %v501_v53 = vld [vmem:[#allocation5 + $0x8] sm:$0xff]  ;;  %v502_v54 = vld [vmem:[#allocation5 + $0x10] sm:$0xff]  ;;  %v503_v55 = vld [vmem:[#allocation5 + $0x18] sm:$0xff]  ;;  %p1261_p7 = scmp.ne.s32.totalorder %s735_s10, %s1260_s11  ;;  %p1796_p9 = scmp.ne.s32.totalorder %s1774_s30, 0 }
  0x9e   : > { %v326_v19 = vmul.f32 %v324_v13, %v324_v13  ;;  %v336_v27 = vmul.f32 0.5, %v334_v25  ;;  %v339_v29 = vmul.f32 0.5, %v337_v26  ;;  %v504_v56 = vld [vmem:[#allocation5 + $0x20] sm:$0xff]  ;;  %v505_v57 = vld [vmem:[#allocation5 + $0x28] sm:$0xff]  ;;  %v506_v58 = vld [vmem:[#allocation5 + $0x30] sm:$0xff]  ;;  %s1374_s26 = smov [#allocation10]  }
  0x9f   : > { %v327_v20 = vmul.f32 %v325_v14, %v325_v14  ;;  %975 = vmatprep.mubr.msk.f32.mxu0 %vm328_vm0, %v335_v16  ;;  %v340_v30 = vmul.f32 0.5, %v338_v28  ;;  %v341_v31 = vmul.f32 %v335_v16, %v335_v16  ;;  %v507_v59 = vld [vmem:[#allocation5 + $0x38] sm:$0xff]  ;;  %v508_v60 = vld [vmem:[#allocation5 + $0x40] sm:$0xff]  ;;  %v509_v61 = vld [vmem:[#allocation5 + $0x48] sm:$0xff]  ;;  %p1262_p0 = pnand %p1261_p7, %p1796_p9  ;;  %s1264_s27 = sshll.u32 %s1374_s26, 4  ;;  %s1265_s27 = int_to_ptr.vmem [resolvable:$false] %s1264_s27 }
  0xa0   : > { %1032 = vmatpush3.bf16.msra.mxu0 %v1029_v5  ;;  %v329_v21 = vsel %vm328_vm0, %v326_v19, 0.0  ;;  %v342_v32 = vmul.f32 %v336_v27, %v336_v27  ;;  %v343_v33 = vmul.f32 %v339_v29, %v339_v29  ;;  %v345_v35 = vmul.f32 %v339_v29, %v335_v16  ;;  %s1266_s16 = scalar_lea.vmem %s1265_s27, 256  ;;  %p1267_p8 = scmp.lt.s32.totalorder %s735_s10, %s1265_s27 }
  0xa1   : > { %v330_v22 = vsel %vm328_vm0, %v327_v20, 0.0  ;;  %1034 = vmatprep.subr.bf16.mxu0 %v1033_v15  ;;  %v344_v34 = vmul.f32 %v340_v30, %v340_v30  ;;  %v346_v36 = vmul.f32 %v340_v30, %v336_v27  ;;  %p1263_p11 = pneg %p1262_p0  ;;  %p1268_p10 = scmp.lt.s32.totalorder %s1266_s16, %s1260_s11 }
  0xa2   : > { %v1641_v24 = vadd.f32 %v330_v22, %v329_v21 }
  0xa3   : > { %p1269_p4 = por %p1268_p10, %p1267_p8 }
  0xa4   : > { %1036 = vmatpush3.bf16.msra.mxu0 %v1033_v15  ;;  %332 = vst.msk [vmem:[%s317_s2] sm:$0xff] %vm328_vm0, %v1641_v24 }
  0xa5   : > { %1038 = vmatprep.subr.bf16.mxu0 %v1037_v23  ;;  %p1270_p6 = pnand %p1269_p4, %p1263_p11 }
  0xa8   : > { %1040 = vmatpush3.bf16.msra.mxu0 %v1037_v23 }
  0xab   : > { %976 = vmatmul.mubr.msk.f32.vlgmr.msra.gmra.mrb[0].mxu0 %vm328_vm0, %v336_v27 }
  0xac   : > { %978 = vmatprep.mubr.msk.f32.mxu0 %vm328_vm0, %v339_v29 }
  0xaf   : > { %979 = vmatmul.mubr.msk.f32.gmra.mrb[2].mxu0 %vm328_vm0, %v340_v30 }
  0xb0   : > { %981 = vmatprep.mubr.msk.f32.mxu0 %vm328_vm0, %v341_v31 }
  0xb3   : > { %982 = vmatmul.mubr.msk.f32.gmra.mrb[4].mxu0 %vm328_vm0, %v342_v32 }
  0xb4   : > { %984 = vmatprep.mubr.msk.f32.mxu0 %vm328_vm0, %v343_v33 }
  0xb7   : > { %985 = vmatmul.mubr.msk.f32.gmra.mrb[6].mxu0 %vm328_vm0, %v344_v34 }
  0xb8   : > { %987 = vmatprep.mubr.msk.f32.mxu0 %vm328_vm0, %v345_v35 }
  0xbb   : > { %988 = vmatmul.mubr.msk.f32.gmra.mrb[8].mxu0 %vm328_vm0, %v346_v36 }
 0x17e   : > { %v977_v38 = vpop.f32.mrb[0].mxu0 }
 0x17f   : > { %v451_v39 = vpop.f32.mrb[1].mxu0 }
 0x180   : > { %v1041_v40 = vpack.c.bf16 %v977_v38, %v451_v39 }
 0x182   : > { %v980_v41 = vpop.f32.mrb[2].mxu0  ;;  %1042 = vmatprep.subr.bf16.mxu1 %v1041_v40 }
 0x183   : > { %v461_v42 = vpop.f32.mrb[3].mxu0  ;;  %1044 = vmatpush3.bf16.msra.mxu1 %v1041_v40 }
 0x184   : > { %v1045_v43 = vpack.c.bf16 %v980_v41, %v461_v42 }
 0x186   : > { %v983_v44 = vpop.f32.mrb[4].mxu0  ;;  %1046 = vmatprep.subr.bf16.mxu1 %v1045_v43 }
 0x187   : > { %v471_v45 = vpop.f32.mrb[5].mxu0  ;;  %1048 = vmatpush3.bf16.msra.mxu1 %v1045_v43 }
 0x188   : > { %v1049_v46 = vpack.c.bf16 %v983_v44, %v471_v45 }
 0x18a   : > { %v986_v47 = vpop.f32.mrb[6].mxu0  ;;  %1050 = vmatprep.subr.bf16.mxu1 %v1049_v46 }
 0x18b   : > { %v481_v48 = vpop.f32.mrb[7].mxu0  ;;  %1052 = vmatpush3.bf16.msra.mxu1 %v1049_v46 }
 0x18c   : > { %v1053_v49 = vpack.c.bf16 %v986_v47, %v481_v48 }
 0x18e   : > { %v989_v50 = vpop.f32.mrb[8].mxu0  ;;  %1054 = vmatprep.subr.bf16.mxu1 %v1053_v49 }
 0x18f   : > { %v491_v51 = vpop.f32.mrb[9].mxu0  ;;  %1056 = vmatpush3.bf16.msra.mxu1 %v1053_v49 }
 0x190   : > { %v1057_v52 = vpack.c.bf16 %v989_v50, %v491_v51 }
 0x192   : > { %1058 = vmatprep.subr.bf16.mxu1 %v1057_v52 }
 0x193   : > { %1060 = vmatpush3.bf16.msra.mxu1 %v1057_v52 }
 0x196   : > { %1011 = vmatmul.mubr.msk.f32.vlgmr.msra.gmra.mrb[0].mxu1 %vm510_vm1, %v501_v53 }
 0x197   : > { %1013 = vmatprep.mubr.msk.f32.mxu1 %vm510_vm1, %v502_v54 }
 0x19a   : > { %1014 = vmatmul.mubr.msk.f32.gmra.mrb[2].mxu1 %vm510_vm1, %v503_v55 }
 0x19b   : > { %1016 = vmatprep.mubr.msk.f32.mxu1 %vm510_vm1, %v504_v56 }
 0x19e   : > { %1017 = vmatmul.mubr.msk.f32.gmra.mrb[4].mxu1 %vm510_vm1, %v505_v57 }
 0x19f   : > { %1019 = vmatprep.mubr.msk.f32.mxu1 %vm510_vm1, %v506_v58 }
 0x1a2   : > { %1020 = vmatmul.mubr.msk.f32.gmra.mrb[6].mxu1 %vm510_vm1, %v507_v59 }
 0x1a3   : > { %1022 = vmatprep.mubr.msk.f32.mxu1 %vm510_vm1, %v508_v60 }
 0x1a6   : > { %1023 = vmatmul.mubr.msk.f32.gmra.mrb[8].mxu1 %vm510_vm1, %v509_v61 }
 0x1a7   : > { %1273 = shalt.err (!%p1270_p6)
}
 0x1a8   : > { %s1274_s23 = scalar_lea.hbm %s1673_s25, 128  ;;  %s1278_s14 = scalar_lea.hbm %s1752_s5, 256 }
 0x1a9   : > { %p1275_p1 = scmp.ne.s32.totalorder %s1673_s25, %s1274_s23  ;;  %p1279_p13 = scmp.lt.u32.totalorder %s1673_s25, %s1752_s5 }
 0x1aa   : > { %p1280_p3 = scmp.lt.u32.totalorder %s1278_s14, %s1274_s23  ;;  %p1282_p7 = scmp.lt.u32.totalorder %s1274_s23, %s1673_s25 }
 0x1ab   : > { %p1276_p2 = pnand %p1275_p1, %p1796_p9 }
 0x1ac   : > { %p1281_p12 = por %p1280_p3, %p1279_p13 }
 0x1ad   : > { %p1277_p5 = pneg %p1276_p2 }
 0x1ae   : > { %p1283_p0 = por %p1282_p7, %p1281_p12 }
 0x1b0   : > { %p1284_p11 = pnand %p1283_p0, %p1277_p5 }
 0x1b2   : > { %1287 = shalt.err (!%p1284_p11)
}
 0x1b3   : > { %1074 = dma.vmem_to_hbm [thread:$0]  (%p1796_p9), %s735_s10, 128, %s1673_s25, %s708_s28  }
 0x1b4   : > { %s310_s17 = scalar_lea.vmem [#allocation9], %s891_s29  ;;  %s1702_s24 = scalar_lea.hbm %s1751_s4, %s915_s0 }
 0x1b5   : > { %s721_s15 = sshll.u32 %s310_s17, 4  ;;  %s703_s29 = scalar_lea.sflag [#allocation4], %s1631_s8  ;;  %s1704_s15 = int_to_ptr.vmem [resolvable:$true] %s721_s15 }
 0x1b6   : > { %s1288_s25 = scalar_lea.vmem %s1704_s15, 128  ;;  %s1375_s10 = smov [#allocation9]  }
 0x1b7   : > { %p1289_p8 = scmp.ne.s32.totalorder %s1704_s15, %s1288_s25  ;;  %s1292_s22 = sshll.u32 %s1375_s10, 4  ;;  %s1293_s22 = int_to_ptr.vmem [resolvable:$false] %s1292_s22 }
 0x1b8   : > { %s1294_s28 = scalar_lea.vmem %s1293_s22, 256  ;;  %p1295_p6 = scmp.lt.s32.totalorder %s1704_s15, %s1293_s22 }
 0x1b9   : > { %p1290_p10 = pnand %p1289_p8, %p1796_p9  ;;  %p1296_p1 = scmp.lt.s32.totalorder %s1294_s28, %s1288_s25 }
 0x1bb   : > { %p1291_p4 = pneg %p1290_p10  ;;  %p1297_p2 = por %p1296_p1, %p1295_p6 }
 0x1bd   : > { %p1298_p5 = pnand %p1297_p2, %p1291_p4 }
 0x269   : > { %v1012_v62 = vpop.f32.mrb[0].mxu1 }
 0x26a   : > { %v607_v63 = vpop.f32.mrb[1].mxu1  ;;  %v657_v1 = vmul.f32 %v1012_v62, %v1012_v62 }
 0x26b   : > { %v656_v5 = vmul.f32 %v607_v63, %v607_v63 }
 0x26d   : > { %v1015_v0 = vpop.f32.mrb[2].mxu1 }
 0x26e   : > { %v659_v2 = vmul.f32 %v1015_v0, %v1015_v0  ;;  %v661_v3 = vmul.f32 %v1015_v0, %v1012_v62  ;;  %v617_v4 = vpop.f32.mrb[3].mxu1 }
 0x26f   : > { %v658_v6 = vmul.f32 %v617_v4, %v617_v4  ;;  %v660_v7 = vmul.f32 %v617_v4, %v607_v63 }
 0x270   : > { %v679_v8 = vadd.f32 %v659_v2, %v657_v1  ;;  %v669_v21 = vmul.f32 2.0, %v661_v3 }
 0x271   : > { %v678_v9 = vadd.f32 %v658_v6, %v656_v5  ;;  %v1018_v10 = vpop.f32.mrb[4].mxu1  ;;  %v668_v26 = vmul.f32 2.0, %v660_v7 }
 0x272   : > { %v663_v11 = vsub.f32 %v1018_v10, %v657_v1  ;;  %v627_v12 = vpop.f32.mrb[5].mxu1  ;;  %v681_v22 = vadd.f32 0.0001, %v679_v8  ;;  %v671_v34 = vadd.f32 0.0001, %v669_v21 }
 0x273   : > { %v662_v13 = vsub.f32 %v627_v12, %v656_v5  ;;  %v680_v27 = vadd.f32 0.0001, %v678_v9  ;;  %v670_v36 = vadd.f32 0.0001, %v668_v26 }
 0x275   : > { %v1021_v14 = vpop.f32.mrb[6].mxu1 }
 0x276   : > { %v665_v15 = vsub.f32 %v1021_v14, %v659_v2  ;;  %v637_v16 = vpop.f32.mrb[7].mxu1 }
 0x277   : > { %v664_v17 = vsub.f32 %v637_v16, %v658_v6 }
 0x278   : > { %v683_v18 = vadd.f32 %v665_v15, %v663_v11 }
 0x279   : > { %v682_v19 = vadd.f32 %v664_v17, %v662_v13  ;;  %v1024_v20 = vpop.f32.mrb[8].mxu1 }
 0x27a   : > { %v685_v23 = vadd.f32 0.0009, %v683_v18  ;;  %v667_v24 = vsub.f32 %v1024_v20, %v661_v3  ;;  %v647_v25 = vpop.f32.mrb[9].mxu1 }
 0x27b   : > { %v684_v28 = vadd.f32 0.0009, %v682_v19  ;;  %v666_v29 = vsub.f32 %v647_v25, %v660_v7 }
 0x27c   : > { %v687_v30 = vmul.f32 %v685_v23, %v681_v22  ;;  %v673_v31 = vmul.f32 2.0, %v667_v24 }
 0x27d   : > { %v686_v32 = vmul.f32 %v684_v28, %v680_v27  ;;  %v672_v33 = vmul.f32 2.0, %v666_v29 }
 0x27e   : > { %1140 = vrcp.f32 %v687_v30  ;;  %v675_v35 = vadd.f32 0.0009, %v673_v31 }
 0x27f   : > { %1142 = vrcp.f32 %v686_v32  ;;  %v674_v37 = vadd.f32 0.0009, %v672_v33 }
 0x280   : > { %v677_v38 = vmul.f32 %v675_v35, %v671_v34 }
 0x281   : > { %v676_v39 = vmul.f32 %v674_v37, %v670_v36 }
 0x288   : > { %v1141_v40 = vpop.eup %1140 }
 0x289   : > { %v1143_v41 = vpop.eup %1142  ;;  %v691_v42 = vmul.f32 %v1141_v40, %v687_v30 }
 0x28a   : > { %v690_v43 = vmul.f32 %v1143_v41, %v686_v32 }
 0x28b   : > { %v693_v44 = vsub.f32 2.0, %v691_v42 }
 0x28c   : > { %v692_v45 = vsub.f32 2.0, %v690_v43 }
 0x28d   : > { %v695_v46 = vmul.f32 %v1141_v40, %v693_v44 }
 0x28e   : > { %v694_v47 = vmul.f32 %v1143_v41, %v692_v45 }
 0x28f   : > { %v697_v48 = vmul.f32 %v695_v46, %v677_v38 }
 0x290   : > { %v696_v49 = vmul.f32 %v694_v47, %v676_v39 }
 0x291   : > { %v699_v50 = vsel %vm328_vm0, %v697_v48, 0.0 }
 0x292   : > { %v698_v51 = vsel %vm328_vm0, %v696_v49, 0.0 }
 0x293   : > { %v700_v52 = vadd.f32 %v699_v50, %v698_v51 }
 0x295   : > { %701 = vst.msk [vmem:[%s310_s17] sm:$0xff] %vm328_vm0, %v700_v52 }
 0x296   : > { %1301 = shalt.err (!%p1298_p5)
}
 0x297   : > { %s1302_s8 = scalar_lea.hbm %s1702_s24, 128  ;;  %s1306_s26 = scalar_lea.hbm %s1751_s4, 256 }
 0x298   : > { %p1303_p13 = scmp.ne.s32.totalorder %s1702_s24, %s1302_s8  ;;  %p1307_p7 = scmp.lt.u32.totalorder %s1702_s24, %s1751_s4 }
 0x299   : > { %p1308_p0 = scmp.lt.u32.totalorder %s1306_s26, %s1302_s8  ;;  %p1310_p8 = scmp.lt.u32.totalorder %s1302_s8, %s1702_s24 }
 0x29a   : > { %p1304_p3 = pnand %p1303_p13, %p1796_p9 }
 0x29b   : > { %p1309_p11 = por %p1308_p0, %p1307_p7 }
 0x29c   : > { %p1305_p12 = pneg %p1304_p3 }
 0x29d   : > { %p1311_p10 = por %p1310_p8, %p1309_p11 }
 0x29f   : > { %p1312_p4 = pnand %p1311_p10, %p1305_p12 }
 0x2a1   : > { %1315 = shalt.err (!%p1312_p4)
}
 0x2a2   : > { %1073 = dma.vmem_to_hbm [thread:$0]  (%p1796_p9), %s1704_s15, 128, %s1702_s24, %s703_s29  }
 0x2a3 PF: > { %s746_s23 = sand.u32 1, %s1354_s18   ;;  %p1797_p6 = scmp.ne.s32.totalorder %s1775_s6, 0 }
 0x2a4   : > { %p1798_p1 = scmp.ge.s32.totalorder %s1366_s21, 2  ;;  %s747_s9 = scalar_lea.sflag [#allocation4], %s746_s23 }
 0x2a6   : > { %p1092_p2 = pnand %p1798_p1, %p1797_p6 }
 0x2a8   : > { %1345 = dma.done.wait (!%p1092_p2), %s747_s9, 128  }
 0x2a9   : > { %1347 = vsyncadd (!%p1092_p2), %s747_s9, 4294967168  ;;  %s756_s13 = scalar_lea.sflag [#allocation11], %s746_s23 }
 0x2aa   : > { %1349 = dma.done.wait (!%p1092_p2), %s756_s13, 128  }
 0x2ab   : > { %1351 = vsyncadd (!%p1092_p2), %s756_s13, 4294967168  ;;  %s1799_s21 = sld [smem:[#allocation18_spill]]  ;;  %s1800_s30 = sld [smem:[#allocation17_spill]] }
 0x2ac   : > { %s1801_s20 = sld [smem:[#allocation19_spill]]  ;;  %s1802_s18 = smov %s1358_s19 }
 0x2b1   : > { %p21_p9 = scmp.ge.s32.totalorder %s1799_s21, 4   ;;  %s1803_s19 = smov %s1800_s30 }
 0x2b3   :  { %23 = sbr.rel (!%p21_p9) target bundleno = 10 (0xa), region = 116 }
 0x2ba   :  { %761 = vsyncpa [#allocation3], 1 }
 0x2bb   :  { %763 = vsyncpa [#allocation3 + $0x1], 1 }
 0x2bc   :  { %764 = vsyncpa [#allocation6], 1 }
 0x2bd   :  { %765 = vsyncpa [#allocation4], 1 }
 0x2be   :  { %767 = vsyncpa [#allocation4 + $0x1], 1 }
 0x2bf   :  { %768 = vsyncpa [#allocation11], 1 }
 0x2c0   :  { %770 = vsyncpa [#allocation11 + $0x1], 1 }

</bundles_post_ra>
